<compile_context>
chip_gen: v7x
topology: tpu7x:2x2x1
jax: 0.10.0
libtpu: 0.0.40
codegen_flags: <defaults>
</compile_context>

<pallas_src>
import functools

import jax
import jax.numpy as jnp
from jax import lax
from jax.experimental import pallas as pl
from jax.experimental.pallas import tpu as pltpu


# <= ~2 MiB per operand block: 3 operands x 2 pipeline buffers x 2 MiB = 12 MiB,
# which fits v5e's 16 MiB default scoped VMEM, v6e's 32 MiB and v7x's 32 MiB.
_TARGET_BLOCK_BYTES = 2 * 1024 * 1024


def _sublane_multiple(itemsize):
    # f32 -> 8 sublanes, bf16/f16 -> 16, int8/fp8 -> 32 (sub-32-bit packs sublanes).
    return max(8, 32 // int(itemsize))


def _pick_lanes(numel, max_lanes=1024):
    """Largest multiple of 128 (<= max_lanes) dividing numel; prefer rows >= 8.

    Returns 0 if numel has no multiple-of-128 divisor (caller falls back to
    pad-and-slice)."""
    best, best_tall = 0, 0
    m = 128
    while m <= max_lanes:
        if numel % m == 0:
            best = m
            if numel // m >= 8:
                best_tall = m
        m += 128
    return best_tall or best


def _pick_tile_r(rows, lanes, itemsize):
    sub = _sublane_multiple(itemsize)
    if rows <= sub:
        return rows  # single block equal to the (short) full row dim
    target = max(sub, (_TARGET_BLOCK_BYTES // (lanes * itemsize)) // sub * sub)
    tile_r = max(sub, min(target, (rows // sub) * sub))
    # Keep >= 2 grid steps so both v7x TensorCores get work (HBM BW is shared);
    # no effect on single-TC v5e/v6e beyond a marginally smaller block.
    while pl.cdiv(rows, tile_r) < 2 and tile_r > sub:
        tile_r = max(sub, ((tile_r // 2) // sub) * sub)
    return tile_r


def _lintrans_kernel(ac_ref, ic_ref, h_ref, jc_ref, *, alpha, epsilon):
    # ac_ref: (1, 1) f32 scalar in SMEM.
    # ic_ref / h_ref / jc_ref: (tile_r, lanes) native-dtype tiles in VMEM.
    ac = ac_ref[0, 0]
    ic = ic_ref[...].astype(jnp.float32)
    h = h_ref[...].astype(jnp.float32)
    t = jnp.float32(alpha) * h + jnp.float32(epsilon)
    jc_ref[...] = ((ic - ac) / t + ac).astype(jc_ref.dtype)


def lintrans_forward(Ic, H, alpha=0.8, epsilon=0.2, *,
                     use_approx_ac=False, donate_ic=False):
    assert Ic.shape == H.shape
    numel = int(H.size)
    k = numel // 1000
    assert k >= 1, "need numel >= 1000 so the bottom-k mean is non-empty (matches PyTorch)"

    out_dtype = Ic.dtype
    itemsize = jnp.dtype(Ic.dtype).itemsize

    h_flat = H.reshape(-1)
    ic_flat = Ic.reshape(-1)

    # --- Ac = mean of the k smallest elements of H, hoisted out of the kernel ---
    if use_approx_ac:
        # TPU-native partial-reduce path, no negation pass (tiny approximation).
        bot_k, _ = lax.approx_min_k(h_flat.astype(jnp.float32), k)
    else:
        # Exact: k smallest of H == -(k largest of -H); negation is fp-exact.
        bot_k = -lax.top_k(-h_flat.astype(jnp.float32), k)[0]
    ac = jnp.mean(bot_k).reshape(1, 1).astype(jnp.float32)  # (1,1) f32, via SMEM

    # --- lane-dense, (mostly) zero-copy tiling of the elementwise pass ---
    lanes = _pick_lanes(numel)
    padded = lanes == 0
    if padded:
        # Fallback: no multiple-of-128 divisor -> pad flat arrays and slice after.
        lanes = 128
        rows = pl.cdiv(numel, lanes)
        pad = rows * lanes - numel
        ic2 = jnp.pad(ic_flat, (0, pad)).reshape(rows, lanes)
        h2 = jnp.pad(h_flat, (0, pad), constant_values=1).reshape(rows, lanes)
    else:
        rows = numel // lanes
        ic2 = ic_flat.reshape(rows, lanes)   # zero-copy reshape: no extra HBM traffic
        h2 = h_flat.reshape(rows, lanes)

    tile_r = _pick_tile_r(rows, lanes, itemsize)
    grid = (pl.cdiv(rows, tile_r),)  # ragged last block: Pallas masks partial writes

    kernel = functools.partial(_lintrans_kernel, alpha=alpha, epsilon=epsilon)

    io_aliases = {1: 0} if (donate_ic and not padded) else {}  # Ic is operand 1

    out = pl.pallas_call(
        kernel,
        out_shape=jax.ShapeDtypeStruct((rows, lanes), out_dtype),
        grid=grid,
        in_specs=[
            pl.BlockSpec(memory_space=pltpu.MemorySpace.SMEM),  # Ac scalar
            pl.BlockSpec((tile_r, lanes), lambda i: (i, 0)),    # Ic tile
            pl.BlockSpec((tile_r, lanes), lambda i: (i, 0)),    # H tile
        ],
        out_specs=pl.BlockSpec((tile_r, lanes), lambda i: (i, 0)),
        compiler_params=pltpu.CompilerParams(
            dimension_semantics=("parallel",),  # independent tiles -> 2-TC sharding on v7x
        ),
        input_output_aliases=io_aliases,
    )(ac, ic2, h2)

    if padded:
        return out.reshape(-1)[:numel].reshape(Ic.shape)
    return out.reshape(Ic.shape)


def _reference_forward(Ic, H, alpha=0.8, epsilon=0.2):
    t = alpha * H + epsilon
    k = H.size // 1000
    Ac = jnp.mean(jnp.sort(H.reshape(-1))[:k])
    return (Ic - Ac) / t + Ac


if __name__ == "__main__":
    key = jax.random.PRNGKey(0)
    k1, k2 = jax.random.split(key)
    # N=2, C=4, H=16, W=16 -> numel = 2048, so k = 2048 // 1000 = 2
    Ic = jax.random.uniform(k1, (2, 4, 16, 16), dtype=jnp.float32)
    H = jax.random.uniform(k2, (2, 4, 16, 16), dtype=jnp.float32, minval=0.1, maxval=1.0)

    Jc = lintrans_forward(Ic, H)
    jax.block_until_ready(Jc)

    ref = _reference_forward(Ic, H)
    assert Jc.shape == Ic.shape
    assert jnp.allclose(Jc, ref, atol=1e-5, rtol=1e-5), "mismatch vs pure-JAX reference"

    print("KERNEL_OK")
</pallas_src>

<mosaic_0001>
module attributes {stable_mosaic.version = 11 : i64} {
  func.func @_lintrans_kernel(%arg0: i32, %arg1: memref<1x1xf32, #tpu.memory_space<smem>>, %arg2: memref<8x256xf32, #tpu.memory_space<vmem>>, %arg3: memref<8x256xf32, #tpu.memory_space<vmem>>, %arg4: memref<8x256xf32, #tpu.memory_space<vmem>>) attributes {dimension_semantics = [#tpu.dimension_semantics<parallel>], iteration_bounds = array<i64: 1>, scalar_prefetch = 0 : i64, scratch_operands = 0 : i64, tpu.core_type = #tpu.core_type<tc>, window_params = [{transform_indices = @transform_0, window_bounds = array<i64: 1, 1>}, {transform_indices = @transform_1, window_bounds = array<i64: 8, 256>}, {transform_indices = @transform_2, window_bounds = array<i64: 8, 256>}, {transform_indices = @transform_3, window_bounds = array<i64: 8, 256>}]} {
    %c0 = arith.constant 0 : index
    %c0_0 = arith.constant 0 : index
    %0 = memref.load %arg1[%c0, %c0_0] : memref<1x1xf32, #tpu.memory_space<smem>>
    %c0_1 = arith.constant 0 : index
    %c0_2 = arith.constant 0 : index
    %1 = vector.load %arg2[%c0_1, %c0_2] : memref<8x256xf32, #tpu.memory_space<vmem>>, vector<8x256xf32>
    %c0_3 = arith.constant 0 : index
    %c0_4 = arith.constant 0 : index
    %2 = vector.load %arg3[%c0_3, %c0_4] : memref<8x256xf32, #tpu.memory_space<vmem>>, vector<8x256xf32>
    %cst = arith.constant 8.000000e-01 : f32
    %3 = vector.broadcast %cst : f32 to vector<8x256xf32>
    %4 = arith.mulf %3, %2 : vector<8x256xf32>
    %cst_5 = arith.constant 2.000000e-01 : f32
    %5 = vector.broadcast %cst_5 : f32 to vector<8x256xf32>
    %6 = arith.addf %4, %5 : vector<8x256xf32>
    %7 = vector.broadcast %0 : f32 to vector<8x256xf32>
    %8 = arith.subf %1, %7 : vector<8x256xf32>
    %9 = arith.divf %8, %6 : vector<8x256xf32>
    %10 = vector.broadcast %0 : f32 to vector<8x256xf32>
    %11 = arith.addf %9, %10 : vector<8x256xf32>
    %c0_6 = arith.constant 0 : index
    %c0_7 = arith.constant 0 : index
    %12 = vector.load %arg4[%c0_6, %c0_7] : memref<8x256xf32, #tpu.memory_space<vmem>>, vector<8x256xf32>
    tpu.vector_store %arg4[%c0_6, %c0_7], %11 {strides = array<i32>} : memref<8x256xf32, #tpu.memory_space<vmem>>, vector<8x256xf32>,
    return
  }
  func.func @transform_0(%arg0: i32) -> (i32, i32) {
    %c0_i32 = arith.constant 0 : i32
    %c0_i32_0 = arith.constant 0 : i32
    %c0_i32_1 = arith.constant 0 : i32
    return %c0_i32, %c0_i32_0 : i32, i32
  }
  func.func @transform_1(%arg0: i32) -> (i32, i32) {
    %c0_i32 = arith.constant 0 : i32
    %c0_i32_0 = arith.constant 0 : i32
    return %arg0, %c0_i32 : i32, i32
  }
  func.func @transform_2(%arg0: i32) -> (i32, i32) {
    %c0_i32 = arith.constant 0 : i32
    %c0_i32_0 = arith.constant 0 : i32
    return %arg0, %c0_i32 : i32, i32
  }
  func.func @transform_3(%arg0: i32) -> (i32, i32) {
    %c0_i32 = arith.constant 0 : i32
    %c0_i32_0 = arith.constant 0 : i32
    return %arg0, %c0_i32 : i32, i32
  }
}

</mosaic_0001>

<bundles_post_ra>
// kernel: tpu_custom_call.1
= control target key start
LH: loop header
LB: loop body
LE: loop exit
PB: predicated region body
PF: predicated region fallthrough
CT: control target
= control target key end

     0   :  { %9 = vsyncpa [#allocation4], 0  ;;  %s217_s0 = inlined_call_operand.<no memory space> [shape: f32[1,1], index: 0, kind: input, shape index: {}]   ;;  %s218_s1 = inlined_call_operand.hbm [shape: f32[8,256], index: 1, kind: input, shape index: {}]   ;;  %s219_s2 = inlined_call_operand.hbm [shape: f32[8,256], index: 2, kind: input, shape index: {}]   ;;  %s220_s3 = inlined_call_operand.hbm [shape: f32[8,256], index: 3, kind: output, shape index: {}]  }
   0x1   :  { %10 = vsyncpa [#allocation7], 0 }
   0x2   :  { %11 = vsyncpa [#allocation5], 0  ;;  %s155_s12 = smov [#allocation3]   ;;  %s156_s14 = smov [#allocation6]  }
   0x3   :  { %s20_s13 = sshll.u32 %s155_s12, 4  ;;  %s30_s15 = sshll.u32 %s156_s14, 4  ;;  %s21_s13 = int_to_ptr.vmem [resolvable:$true] %s20_s13  ;;  %s31_s15 = int_to_ptr.vmem [resolvable:$true] %s30_s15 }
   0x4   :  { %s83_s18 = scalar_lea.hbm %s218_s1, 256 }
   0x5   :  { %p84_p0 = scmp.ne.s32.totalorder %s218_s1, %s83_s18  ;;  %p87_p1 = scmp.lt.u32.totalorder %s83_s18, %s218_s1 }
   0x7   :  { %p89_p2 = pnand %p87_p1, %p84_p0 }
   0x9   :  { %92 = shalt.err (!%p89_p2)
}
   0xa   :  { %s93_s23 = scalar_lea.vmem %s21_s13, 256  ;;  %p98_p4 = scmp.lt.s32.totalorder %s21_s13, %s21_s13 }
   0xb   :  { %p94_p3 = scmp.ne.s32.totalorder %s21_s13, %s93_s23  ;;  %p99_p5 = scmp.lt.s32.totalorder %s93_s23, %s93_s23 }
   0xd   :  { %p100_p6 = por %p99_p5, %p98_p4 }
   0xf   :  { %p101_p7 = pnand %p100_p6, %p94_p3 }
  0x11   :  { %104 = shalt.err (!%p101_p7)
}
  0x12   :  { %23 = dma.hbm_to_vmem [thread:$0]  %s218_s1, 256, %s21_s13, [#allocation4]  }
  0x13   :  { %s105_s28 = scalar_lea.hbm %s219_s2, 256 }
  0x14   :  { %p106_p8 = scmp.ne.s32.totalorder %s219_s2, %s105_s28  ;;  %p109_p9 = scmp.lt.u32.totalorder %s105_s28, %s219_s2 }
  0x16   :  { %p111_p10 = pnand %p109_p9, %p106_p8 }
  0x18   :  { %114 = shalt.err (!%p111_p10)
}
  0x19   :  { %s115_s6 = scalar_lea.vmem %s31_s15, 256  ;;  %p120_p12 = scmp.lt.s32.totalorder %s31_s15, %s31_s15 }
  0x1a   :  { %p116_p11 = scmp.ne.s32.totalorder %s31_s15, %s115_s6  ;;  %p121_p13 = scmp.lt.s32.totalorder %s115_s6, %s115_s6 }
  0x1c   :  { %p122_p0 = por %p121_p13, %p120_p12 }
  0x1e   :  { %p123_p1 = pnand %p122_p0, %p116_p11 }
  0x20   :  { %126 = shalt.err (!%p123_p1)
}
  0x21   :  { %33 = dma.hbm_to_vmem [thread:$0]  %s219_s2, 256, %s31_s15, [#allocation7]  }
  0x22   :  { %149 = dma.done.wait [#allocation4], 256  }
  0x23   :  { %150 = vsyncadd [#allocation4], 4294967040 }
  0x24   :  { %151 = dma.done.wait [#allocation7], 256  }
  0x25   :  { %152 = vsyncadd [#allocation7], 4294967040  ;;  %v43_v0 = vld [vmem:[#allocation6] sm:$0xff]  ;;  %v44_v2 = vld [vmem:[#allocation6 + $0x8] sm:$0xff]  ;;  %v49_v7 = vstv %s217_s0  ;;  %s157_s2 = smov [#allocation8]  }
  0x26   :  { %v45_v1 = vmul.f32 0.8, %v43_v0  ;;  %v46_v3 = vmul.f32 0.8, %v44_v2  ;;  %v41_v6 = vld [vmem:[#allocation3] sm:$0xff]  ;;  %v42_v8 = vld [vmem:[#allocation3 + $0x8] sm:$0xff] }
  0x27   :  { %v50_v9 = vsub.f32 %v41_v6, %v49_v7  ;;  %v51_v10 = vsub.f32 %v42_v8, %v49_v7  ;;  %s66_s10 = sshll.u32 %s157_s2, 4  ;;  %s67_s10 = int_to_ptr.vmem [resolvable:$true] %s66_s10 }
  0x28   :  { %v47_v4 = vadd.f32 0.2, %v45_v1  ;;  %v48_v5 = vadd.f32 0.2, %v46_v3  ;;  %s127_s11 = scalar_lea.vmem %s67_s10, 256  ;;  %p132_p3 = scmp.lt.s32.totalorder %s67_s10, %s67_s10 }
  0x29   :  { %p128_p2 = scmp.ne.s32.totalorder %s67_s10, %s127_s11  ;;  %p133_p4 = scmp.lt.s32.totalorder %s127_s11, %s127_s11 }
  0x2a   :  { %79 = vrcp.f32 %v47_v4 }
  0x2b   :  { %81 = vrcp.f32 %v48_v5  ;;  %p134_p5 = por %p133_p4, %p132_p3 }
  0x2d   :  { %p135_p6 = pnand %p134_p5, %p128_p2 }
  0x34   :  { %v80_v11 = vpop.eup %79 }
  0x35   :  { %v82_v12 = vpop.eup %81  ;;  %v53_v13 = vmul.f32 %v80_v11, %v50_v9 }
  0x36   :  { %v55_v14 = vmul.f32 %v82_v12, %v51_v10 }
  0x37   :  { %v56_v15 = vadd.f32 %v53_v13, %v49_v7 }
  0x38   :  { %v57_v16 = vadd.f32 %v55_v14, %v49_v7 }
  0x39   :  { %58 = vst [vmem:[#allocation8] sm:$0xff] %v56_v15 }
  0x3a   :  { %59 = vst [vmem:[#allocation8 + $0x8] sm:$0xff] %v57_v16 }
  0x3b   :  { %138 = shalt.err (!%p135_p6)
}
  0x3c   :  { %s139_s13 = scalar_lea.hbm %s220_s3, 256 }
  0x3d   :  { %p140_p7 = scmp.ne.s32.totalorder %s220_s3, %s139_s13  ;;  %p143_p8 = scmp.lt.u32.totalorder %s139_s13, %s220_s3 }
  0x3f   :  { %p145_p9 = pnand %p143_p8, %p140_p7 }
  0x41   :  { %148 = shalt.err (!%p145_p9)
}
  0x42   :  { %69 = dma.vmem_to_hbm [thread:$0]  %s67_s10, 256, %s220_s3, [#allocation5]  }
  0x43   :  { %153 = dma.done.wait [#allocation5], 256  }
  0x44   :  { %154 = vsyncadd [#allocation5], 4294967040 }
  0x45   :  { %73 = vsyncpa [#allocation4], 1 }
  0x46   :  { %74 = vsyncpa [#allocation7], 1 }
  0x47   :  { %75 = vsyncpa [#allocation5], 1 }

</bundles_post_ra>
